<compile_context>
chip_gen: v7x
topology: tpu7x:2x2x1
jax: 0.10.0
libtpu: 0.0.40
codegen_flags: <defaults>
</compile_context>

<pallas_src>
import functools

import jax
import jax.numpy as jnp
from jax import lax
from jax.experimental import pallas as pl
from jax.experimental.pallas import tpu as pltpu


def _linear_row_kernel(x_ref, w_ref, b_ref, o_ref, acc_ref, *, d, tk, needs_mask):
    """One (batch-tile, K-chunk) step of y = x @ w.T + b.

    x_ref:   (TB, TK) VMEM  -- streamed batch x K tile
    w_ref:   (1, TK)  VMEM  -- weight-row chunk
    b_ref:   (1, 1)   SMEM  -- scalar bias
    o_ref:   (1, TB)  VMEM  -- lane-dense output row for this batch tile
    acc_ref: (1, TB)  VMEM  -- f32 accumulator, persists across K steps
    """
    k = pl.program_id(1)

    @pl.when(k == 0)
    def _():
        acc_ref[...] = jnp.zeros_like(acc_ref)

    x = x_ref[...].astype(jnp.float32)            # (TB, TK)
    w = w_ref[...].astype(jnp.float32)            # (1, TK)
    prod = x * w                                  # VPU broadcast-multiply
    if needs_mask:
        # Zero contributions from the ragged K tail (columns >= d).
        col = k * tk + lax.broadcasted_iota(jnp.int32, prod.shape, 1)
        prod = jnp.where(col < d, prod, 0.0)
    acc_ref[...] += jnp.sum(prod, axis=-1)[None, :]   # XLU cross-lane reduce

    @pl.when(k == pl.num_programs(1) - 1)
    def _():
        o_ref[...] = (acc_ref[...] + b_ref[0, 0]).astype(o_ref.dtype)


def _vmem_budget_bytes():
    """Half of physical VMEM, capped at 64 MiB (safe on v5e/v6e/v7x)."""
    phys = 64 << 20  # conservative fallback = v7x per-TC VMEM
    try:
        phys = int(getattr(pltpu.get_tpu_info(), "vmem_capacity_bytes", phys))
    except Exception:
        pass
    return min(phys // 2, 64 << 20)


def _choose_tiles(b, d, itemsize, budget):
    """Pick (TB, TK) so the aggregate VMEM footprint fits `budget`."""
    tk = d if d <= 2048 else 2048            # K chunk; multiple of 128 when tiled

    def footprint(tb):
        x_buf = 2 * tb * tk * itemsize       # double-buffered x tile
        w_buf = 2 * 8 * tk * itemsize        # double-buffered weight row (sublane-padded)
        o_buf = 2 * 8 * tb * itemsize        # (1, TB) output block (sublane-padded)
        acc = 8 * tb * 4                     # f32 accumulator scratch
        tmp = 2 * tb * tk * 4                # in-kernel f32 upcast + product temporaries
        return x_buf + w_buf + o_buf + acc + tmp

    tb = 2048
    while tb > 128 and footprint(tb) > budget:
        tb //= 2

    if tb >= b:
        if b >= 256:
            # Split into >=2 batch tiles so "parallel" can shard across the two
            # TensorCores on v7x; keep the output block lane-dense (x128).
            tb = 128 * ((b + 255) // 256)
        else:
            tb = b                           # one tile covers the whole (small) batch
    return tb, tk


def alignment_model_forward(x, weight, bias):
    """Equivalent of nn.Linear(input_size, 1): y = x @ weight.T + bias.

    Args:
      x:      (..., input_size) float32
      weight: (1, input_size)   -- PyTorch Linear weight layout
      bias:   (1,)              -- PyTorch Linear bias
    Returns:
      (..., 1) float32
    """
    orig_shape = x.shape
    d = orig_shape[-1]
    x2 = x.reshape(-1, d)
    b = x2.shape[0]

    budget = _vmem_budget_bytes()
    tb, tk = _choose_tiles(b, d, x2.dtype.itemsize, budget)
    nb = pl.cdiv(b, tb)
    nk = pl.cdiv(d, tk)
    needs_mask = (d % tk) != 0

    w_row = weight.reshape(1, d)
    b_smem = bias.reshape(1, 1).astype(jnp.float32)

    kernel = functools.partial(_linear_row_kernel, d=d, tk=tk, needs_mask=needs_mask)

    # TODO(synk): optional bf16 streaming of x (with in-kernel f32 accumulate)
    # would halve HBM traffic, but changes numerics vs. the f32 nn.Linear spec.
    out_row = pl.pallas_call(
        kernel,
        out_shape=jax.ShapeDtypeStruct((1, b), x2.dtype),
        grid_spec=pltpu.PrefetchScalarGridSpec(
            num_scalar_prefetch=0,
            grid=(nb, nk),
            in_specs=[
                # Streamed, double-buffered (TB, TK) tiles of x.
                pl.BlockSpec((tb, tk), lambda i, k: (i, k)),
                # Weight-row chunk (resident across the batch axis).
                pl.BlockSpec((1, tk), lambda i, k: (0, k)),
                # Scalar bias in SMEM: no VMEM tile, no per-step DMA.
                pl.BlockSpec(memory_space=pltpu.MemorySpace.SMEM),
            ],
            # Lane-dense (1, TB) output row; same block across the K axis.
            out_specs=pl.BlockSpec((1, tb), lambda i, k: (0, i)),
            scratch_shapes=[pltpu.VMEM((1, tb), jnp.float32)],
        ),
        compiler_params=pltpu.CompilerParams(
            dimension_semantics=("parallel", "arbitrary"),
            vmem_limit_bytes=int(budget),
        ),
        cost_estimate=pl.CostEstimate(
            flops=2 * b * d,
            transcendentals=0,
            bytes_accessed=x2.dtype.itemsize * (b * d + d + b),
        ),
    )(x2, w_row, b_smem)

    y = out_row[0, :].reshape(b, 1)
    return y.reshape(*orig_shape[:-1], 1)


if __name__ == "__main__":
    key = jax.random.PRNGKey(0)
    kx, kw, kb, kx2 = jax.random.split(key, 4)

    # ---- Case 1: small demo shapes matching the module (batch=8, input=32) ----
    batch, input_size = 8, 32
    bound = 1.0 / (input_size ** 0.5)
    x = jax.random.normal(kx, (batch, input_size), dtype=jnp.float32)
    weight = jax.random.uniform(kw, (1, input_size), jnp.float32,
                                minval=-bound, maxval=bound)
    bias = jax.random.uniform(kb, (1,), jnp.float32, minval=-bound, maxval=bound)

    y = jax.block_until_ready(alignment_model_forward(x, weight, bias))
    y_ref = jnp.sum(x * weight, axis=-1, keepdims=True) + bias
    assert y.shape == (batch, 1)
    assert jnp.allclose(y, y_ref, atol=1e-5, rtol=1e-5)

    # ---- Case 2: ragged batch tile + K-reduction axis + K-tail masking ----
    b2, d2 = 300, 2304  # B % TB != 0, D > 2048 and D % TK != 0
    bound2 = 1.0 / (d2 ** 0.5)
    x_big = jax.random.normal(kx2, (b2, d2), dtype=jnp.float32)
    w_big = jax.random.uniform(kw, (1, d2), jnp.float32,
                               minval=-bound2, maxval=bound2)
    bias_big = jax.random.uniform(kb, (1,), jnp.float32,
                                  minval=-bound2, maxval=bound2)

    y_big = jax.block_until_ready(alignment_model_forward(x_big, w_big, bias_big))
    y_big_ref = jnp.sum(x_big * w_big, axis=-1, keepdims=True) + bias_big
    assert y_big.shape == (b2, 1)
    assert jnp.allclose(y_big, y_big_ref, atol=1e-4, rtol=1e-4)

    print("KERNEL_OK")
</pallas_src>

<mosaic_0001>
module attributes {stable_mosaic.version = 11 : i64} {
  func.func @_linear_row_kernel(%arg0: i32, %arg1: i32, %arg2: memref<8x32xf32, #tpu.memory_space<vmem>>, %arg3: memref<1x32xf32, #tpu.memory_space<vmem>>, %arg4: memref<1x1xf32, #tpu.memory_space<smem>>, %arg5: memref<1x8xf32, #tpu.memory_space<vmem>>, %arg6: memref<1x8xf32, #tpu.memory_space<vmem>>) attributes {dimension_semantics = [#tpu.dimension_semantics<parallel>, #tpu.dimension_semantics<arbitrary>], iteration_bounds = array<i64: 1, 1>, scalar_prefetch = 0 : i64, scratch_operands = 1 : i64, tpu.core_type = #tpu.core_type<tc>, window_params = [{transform_indices = @transform_0, window_bounds = array<i64: 8, 32>}, {transform_indices = @transform_1, window_bounds = array<i64: 1, 32>}, {transform_indices = @transform_2, window_bounds = array<i64: 1, 1>}, {transform_indices = @transform_3, window_bounds = array<i64: 1, 8>}]} {
    %c0_i32 = arith.constant 0 : i32
    %0 = arith.cmpi eq, %arg1, %c0_i32 : i32
    %1 = arith.extui %0 : i1 to i32
    %c0_i32_0 = arith.constant 0 : i32
    %2 = arith.cmpi ne, %1, %c0_i32_0 : i32
    scf.if %2 {
      %cst_10 = arith.constant 0.000000e+00 : f32
      %15 = vector.broadcast %cst_10 : f32 to vector<1x8xf32>
      %c0_11 = arith.constant 0 : index
      %c0_12 = arith.constant 0 : index
      %16 = vector.load %arg6[%c0_11, %c0_12] : memref<1x8xf32, #tpu.memory_space<vmem>>, vector<1x8xf32>
      tpu.vector_store %arg6[%c0_11, %c0_12], %15 {strides = array<i32>} : memref<1x8xf32, #tpu.memory_space<vmem>>, vector<1x8xf32>,
    } else {
    }
    %c0 = arith.constant 0 : index
    %c0_1 = arith.constant 0 : index
    %3 = vector.load %arg2[%c0, %c0_1] : memref<8x32xf32, #tpu.memory_space<vmem>>, vector<8x32xf32>
    %c0_2 = arith.constant 0 : index
    %c0_3 = arith.constant 0 : index
    %4 = vector.load %arg3[%c0_2, %c0_3] : memref<1x32xf32, #tpu.memory_space<vmem>>, vector<1x32xf32>
    %5 = vector.broadcast %4 : vector<1x32xf32> to vector<8x32xf32>
    %6 = arith.mulf %3, %5 : vector<8x32xf32>
    %c0_4 = arith.constant 0 : index
    %c0_5 = arith.constant 0 : index
    %7 = vector.load %arg6[%c0_4, %c0_5] : memref<1x8xf32, #tpu.memory_space<vmem>>, vector<1x8xf32>
    %cst = arith.constant dense<0.000000e+00> : vector<8xf32>
    %8 = vector.multi_reduction <add>, %6, %cst [1] : vector<8x32xf32> to vector<8xf32>
    %9 = vector.shape_cast %8 : vector<8xf32> to vector<1x8xf32>
    %10 = arith.addf %7, %9 : vector<1x8xf32>
    %c0_6 = arith.constant 0 : index
    %c0_7 = arith.constant 0 : index
    %11 = vector.load %arg6[%c0_6, %c0_7] : memref<1x8xf32, #tpu.memory_space<vmem>>, vector<1x8xf32>
    tpu.vector_store %arg6[%c0_6, %c0_7], %10 {strides = array<i32>} : memref<1x8xf32, #tpu.memory_space<vmem>>, vector<1x8xf32>,
    %c0_i32_8 = arith.constant 0 : i32
    %12 = arith.cmpi eq, %arg1, %c0_i32_8 : i32
    %13 = arith.extui %12 : i1 to i32
    %c0_i32_9 = arith.constant 0 : i32
    %14 = arith.cmpi ne, %13, %c0_i32_9 : i32
    scf.if %14 {
      %c0_10 = arith.constant 0 : index
      %c0_11 = arith.constant 0 : index
      %15 = vector.load %arg6[%c0_10, %c0_11] : memref<1x8xf32, #tpu.memory_space<vmem>>, vector<1x8xf32>
      %c0_12 = arith.constant 0 : index
      %c0_13 = arith.constant 0 : index
      %16 = memref.load %arg4[%c0_12, %c0_13] : memref<1x1xf32, #tpu.memory_space<smem>>
      %17 = vector.broadcast %16 : f32 to vector<1x8xf32>
      %18 = arith.addf %15, %17 : vector<1x8xf32>
      %c0_14 = arith.constant 0 : index
      %c0_15 = arith.constant 0 : index
      %19 = vector.load %arg5[%c0_14, %c0_15] : memref<1x8xf32, #tpu.memory_space<vmem>>, vector<1x8xf32>
      tpu.vector_store %arg5[%c0_14, %c0_15], %18 {strides = array<i32>} : memref<1x8xf32, #tpu.memory_space<vmem>>, vector<1x8xf32>,
    } else {
    }
    return
  }
  func.func @transform_0(%arg0: i32, %arg1: i32) -> (i32, i32) {
    %c0_i32 = arith.constant 0 : i32
    return %arg0, %arg1 : i32, i32
  }
  func.func @transform_1(%arg0: i32, %arg1: i32) -> (i32, i32) {
    %c0_i32 = arith.constant 0 : i32
    %c0_i32_0 = arith.constant 0 : i32
    return %c0_i32, %arg1 : i32, i32
  }
  func.func @transform_2(%arg0: i32, %arg1: i32) -> (i32, i32) {
    %c0_i32 = arith.constant 0 : i32
    %c0_i32_0 = arith.constant 0 : i32
    %c0_i32_1 = arith.constant 0 : i32
    return %c0_i32, %c0_i32_0 : i32, i32
  }
  func.func @transform_3(%arg0: i32, %arg1: i32) -> (i32, i32) {
    %c0_i32 = arith.constant 0 : i32
    %c0_i32_0 = arith.constant 0 : i32
    return %c0_i32, %arg0 : i32, i32
  }
}

</mosaic_0001>

<bundles_post_ra>
// kernel: tpu_custom_call.1
= control target key start
LH: loop header
LB: loop body
LE: loop exit
PB: predicated region body
PF: predicated region fallthrough
CT: control target
= control target key end

     0   :  { %9 = vsyncpa [#allocation5], 0  ;;  %s293_s0 = inlined_call_operand.hbm [shape: f32[8,32], index: 0, kind: input, shape index: {}]   ;;  %s294_s1 = inlined_call_operand.vmem [shape: f32[1,32], index: 1, kind: input, shape index: {}]   ;;  %s295_s2 = inlined_call_operand.<no memory space> [shape: f32[1,1], index: 2, kind: input, shape index: {}]   ;;  %s296_s3 = inlined_call_operand.hbm [shape: f32[1,8], index: 3, kind: output, shape index: {}]  }
   0x1   :  { %10 = vsyncpa [#allocation6], 0  ;;  %s235_s12 = smov [#allocation4]   ;;  %s187_s16 = scalar_lea.hbm %s293_s0, 128 }
   0x2   :  { %s17_s13 = sshll.u32 %s235_s12, 4  ;;  %p188_p0 = scmp.ne.s32.totalorder %s293_s0, %s187_s16  ;;  %s18_s13 = int_to_ptr.vmem [resolvable:$true] %s17_s13 }
   0x3   :  { %p191_p1 = scmp.lt.u32.totalorder %s187_s16, %s293_s0 }
   0x5   :  { %p193_p2 = pnand %p191_p1, %p188_p0 }
   0x7   :  { %196 = shalt.err (!%p193_p2)
}
   0x8   :  { %s197_s21 = scalar_lea.vmem %s18_s13, 128  ;;  %p202_p4 = scmp.lt.s32.totalorder %s18_s13, %s18_s13 }
   0x9   :  { %p198_p3 = scmp.ne.s32.totalorder %s18_s13, %s197_s21  ;;  %p203_p5 = scmp.lt.s32.totalorder %s197_s21, %s197_s21 }
   0xb   :  { %p204_p6 = por %p203_p5, %p202_p4 }
   0xd   :  { %p205_p7 = pnand %p204_p6, %p198_p3 }
   0xf   :  { %208 = shalt.err (!%p205_p7)
}
  0x10   :  { %20 = dma.hbm_to_vmem [thread:$0]  %s293_s0, 128, %s18_s13, [#allocation5]  }
  0x11   :  { %231 = dma.done.wait [#allocation5], 128  }
  0x12   :  { %232 = vsyncadd [#allocation5], 4294967168  ;;  %v34_v0 = vld [vmem:[#allocation4] sm:$0xff]  ;;  %v180_v1 = vld [vmem:[%s294_s1] ss:$0 sm:$0xff]  ;;  %vm44_vm0 = vcmask 261120   ;;  %v49_v5 = vlaneseq  ;;  %v162_v50 = vstv %s295_s2 }
  0x13   :  { %v42_v2 = vmul.f32 %v180_v1, %v34_v0  ;;  %v236_v4 = vmov 0   ;;  %v237_v9 = vmov 1966171168   ;;  %vm32_vm1 = vcmask 57344   ;;  %s239_s26 = smov [#allocation7]  }
  0x14   :  { %186 = vset.pattern.permute.xlu0 %v236_v4  ;;  %v50_v6 = vshrl.u32 %v49_v5, 7  ;;  %v134_v7 = vand.u32 127, %v49_v5  ;;  %v86_v10 = vunpack.c.l.s4 %v237_v9  ;;  %v238_v43 = vmov 0.0   ;;  %s171_s27 = sshll.u32 %s239_s26, 4  ;;  %s172_s27 = int_to_ptr.vmem [resolvable:$true] %s171_s27 }
  0x15   :  { %v45_v3 = vsel %vm44_vm0, %v42_v2, 0.0  ;;  %33 = vst.msk [vmem:[#allocation2] sm:$0x1] %vm32_vm1, %v238_v43  ;;  %s209_s28 = scalar_lea.vmem %s172_s27, 16  ;;  %s213_s29 = scalar_lea.vmem %s172_s27, 32 }
  0x16   :  { %46 = vadd.xlane.f32.xlu0 %v45_v3  ;;  %v137_v8 = vsub.s32 %v134_v7, %v50_v6  ;;  %v87_v11 = vunpack.c.0.s8 %v86_v10  ;;  %v51_v12 = vsub.s32 0, %v50_v6  ;;  %v55_v13 = vsub.s32 1, %v50_v6  ;;  %p210_p8 = scmp.ne.s32.totalorder %s172_s27, %s209_s28  ;;  %p214_p9 = scmp.lt.s32.totalorder %s172_s27, %s172_s27 }
  0x17   :  { %v59_v14 = vsub.s32 2, %v50_v6  ;;  %v63_v15 = vsub.s32 3, %v50_v6  ;;  %v67_v16 = vsub.s32 4, %v50_v6  ;;  %v71_v17 = vsub.s32 5, %v50_v6  ;;  %p215_p10 = scmp.lt.s32.totalorder %s213_s29, %s209_s28 }
  0x18   :  { %v75_v18 = vsub.s32 6, %v50_v6  ;;  %v79_v19 = vsub.s32 7, %v50_v6  ;;  %v90_v21 = vsub.s32 %v87_v11, %v50_v6 }
  0x19   :  { %p216_p11 = por %p215_p10, %p214_p9 }
  0x1b   :  { %p217_p12 = pnand %p216_p11, %p210_p8 }
  0x1c   :  { %v43_v47 = vld [vmem:[#allocation2] sm:$0x1] }
  0xa3   :  { %v47_v20 = vpop.xlane.xlu0 %46 }
  0xa4   :  { %v52_v22 = vrot.slane %v47_v20, %v51_v12  ;;  %v56_v23 = vrot.slane %v47_v20, %v55_v13  ;;  %v60_v24 = vrot.slane %v47_v20, %v59_v14  ;;  %v64_v25 = vrot.slane %v47_v20, %v63_v15 }
  0xa5   :  { %v68_v26 = vrot.slane %v47_v20, %v67_v16  ;;  %v72_v27 = vrot.slane %v47_v20, %v71_v17  ;;  %v76_v28 = vrot.slane %v47_v20, %v75_v18  ;;  %v80_v29 = vrot.slane %v47_v20, %v79_v19 }
  0xa6   :  { %v81_v30 = vcombine.low %v52_v22, %v56_v23  ;;  %v82_v31 = vcombine.low %v60_v24, %v64_v25 }
  0xa7   :  { %v83_v32 = vcombine.low %v68_v26, %v72_v27  ;;  %v84_v33 = vcombine.low %v76_v28, %v80_v29 }
  0xa8   :  { %v91_v34 = vrot.slane %v81_v30, %v90_v21  ;;  %v98_v35 = vrot.slane %v82_v31, %v90_v21 }
  0xa9   :  { %v105_v36 = vrot.slane %v83_v32, %v90_v21  ;;  %v112_v37 = vrot.slane %v84_v33, %v90_v21 }
  0xaa   :  { %v113_v38 = vcombine.low %v91_v34, %v98_v35 }
  0xab   :  { %v114_v39 = vcombine.low %v105_v36, %v112_v37 }
  0xac   :  { %v121_v40 = vrot.slane %v113_v38, %v90_v21 }
  0xad   :  { %v128_v41 = vrot.slane %v114_v39, %v90_v21 }
  0xaf   :  { %v129_v42 = vcombine.low %v121_v40, %v128_v41 }
  0xb1   :  { %131 = vperm.xlu0 %186, %v129_v42  }
 0x130   :  { %v132_v44 = vpop.permute.xlu0 %131 }
 0x131   :  { %v138_v45 = vrot.slane %v132_v44, %v137_v8 }
 0x133   :  { %v145_v46 = vrot.slane %v138_v45, %v90_v21 }
 0x135   :  { %v152_v48 = vrot.slane %v145_v46, %v90_v21 }
 0x137   :  { %v154_v49 = vadd.f32 %v152_v48, %v43_v47 }
 0x139   :  { %156 = vst.msk [vmem:[#allocation2] sm:$0x1] %vm32_vm1, %v154_v49 }
 0x140   :  { %v160_v51 = vld [vmem:[#allocation2] sm:$0x1] }
 0x141   :  { %v163_v52 = vadd.f32 %v162_v50, %v160_v51 }
 0x143   :  { %164 = vst.msk [vmem:[#allocation7] sm:$0x1] %vm32_vm1, %v163_v52 }
 0x144   :  { %220 = shalt.err (!%p217_p12)
}
 0x145   :  { %s221_s5 = scalar_lea.hbm %s296_s3, 16 }
 0x146   :  { %p222_p13 = scmp.ne.s32.totalorder %s296_s3, %s221_s5  ;;  %p225_p0 = scmp.lt.u32.totalorder %s221_s5, %s296_s3 }
 0x148   :  { %p227_p1 = pnand %p225_p0, %p222_p13 }
 0x14a   :  { %230 = shalt.err (!%p227_p1)
}
 0x14b   :  { %174 = dma.vmem_to_hbm [thread:$0]  %s172_s27, 16, %s296_s3, [#allocation6]  }
 0x14c   :  { %233 = dma.done.wait [#allocation6], 16  }
 0x14d   :  { %234 = vsyncadd [#allocation6], 4294967280 }
 0x14e   :  { %178 = vsyncpa [#allocation5], 1 }
 0x14f   :  { %179 = vsyncpa [#allocation6], 1 }

</bundles_post_ra>
